<compile_context>
chip_gen: v7x
topology: tpu7x:2x2x1
jax: 0.10.0
libtpu: 0.0.40
codegen_flags: <defaults>
</compile_context>

<pallas_src>
import functools

import jax
import jax.numpy as jnp
from jax.experimental import pallas as pl
from jax.experimental.pallas import tpu as pltpu


def _round_up(v, m):
    return ((v + m - 1) // m) * m


# ----------------------------------------------------------------------------
# Fused whole-network kernel (weights resident in VMEM).
# ----------------------------------------------------------------------------
def _fcn_fused_kernel(*refs, num_layers: int, compute_dtype):
    """refs = (x_ref, w1_ref, b1_ref, ..., wN_ref, bN_ref, o_ref).

    y = x; for each layer: y = (y.bf16 @ W.bf16 -> f32) + b; ReLU on all but
    the last layer.  Everything stays in vregs/VMEM for one batch tile.
    """
    x_ref = refs[0]
    o_ref = refs[-1]
    y = x_ref[...]                                   # compute_dtype activations
    for li in range(num_layers):
        w_ref = refs[1 + 2 * li]
        b_ref = refs[2 + 2 * li]
        y = jnp.dot(y.astype(compute_dtype), w_ref[...],
                    preferred_element_type=jnp.float32)   # MXU, f32 accumulate
        y = y + b_ref[0:1, :]                        # f32 bias add (row bcast)
        if li < num_layers - 1:
            y = jnp.maximum(y, 0.0)                  # f32 ReLU (v5e-safe)
    o_ref[...] = y.astype(o_ref.dtype)


# ----------------------------------------------------------------------------
# Fallback: one K/N-tiled Linear(+ReLU) per layer, for layers too wide to keep
# resident in VMEM.
# ----------------------------------------------------------------------------
def _tiled_linear_kernel(x_ref, w_ref, b_ref, o_ref, acc_ref, *, apply_relu: bool):
    k = pl.program_id(2)

    @pl.when(k == 0)
    def _():
        acc_ref[...] = jnp.zeros_like(acc_ref)

    acc_ref[...] += jnp.dot(x_ref[...], w_ref[...],
                            preferred_element_type=jnp.float32)

    @pl.when(k == pl.num_programs(2) - 1)
    def _():
        y = acc_ref[...] + b_ref[0:1, :]
        if apply_relu:
            y = jnp.maximum(y, 0.0)
        o_ref[...] = y.astype(o_ref.dtype)


def _tiled_linear(xp, wp, bp, *, apply_relu, out_dtype, tm=256, tn=256, tk=512):
    """Linear(+ReLU) on pre-padded operands (dims already (8,128)-aligned)."""
    M, K = xp.shape
    K2, N = wp.shape
    assert K == K2
    tm, tn, tk = min(tm, M), min(tn, N), min(tk, K)
    while M % tm:            # M is a multiple of 8, so tm=8 always terminates
        tm -= 8
    while N % tn:            # N, K are multiples of 128
        tn -= 128
    while K % tk:
        tk -= 128
    grid = (M // tm, N // tn, K // tk)
    return pl.pallas_call(
        functools.partial(_tiled_linear_kernel, apply_relu=apply_relu),
        out_shape=jax.ShapeDtypeStruct((M, N), out_dtype),
        grid=grid,
        in_specs=[pl.BlockSpec((tm, tk), lambda i, j, k: (i, k)),
                  pl.BlockSpec((tk, tn), lambda i, j, k: (k, j)),
                  pl.BlockSpec((8, tn), lambda i, j, k: (0, j))],
        out_specs=pl.BlockSpec((tm, tn), lambda i, j, k: (i, j)),
        scratch_shapes=[pltpu.VMEM((tm, tn), jnp.float32)],
        compiler_params=pltpu.CompilerParams(
            dimension_semantics=("parallel", "parallel", "arbitrary")),
    )(xp, wp, bp)


# ----------------------------------------------------------------------------
# Parameter init (matches torch.nn.Linear default init) and one-time prep.
# ----------------------------------------------------------------------------
def init_fashion_fcn_params(key, layer_dim):
    """Per layer: (W: (Din, Dout), b: (1, Dout)) in f32, torch-default init."""
    params = []
    num_layers = len(layer_dim) - 1
    for i in range(num_layers):
        k_w, k_b, key = jax.random.split(key, 3)
        fan_in, fan_out = layer_dim[i], layer_dim[i + 1]
        bound = 1.0 / jnp.sqrt(fan_in)
        w = jax.random.uniform(k_w, (fan_in, fan_out), jnp.float32, -bound, bound)
        b = jax.random.uniform(k_b, (1, fan_out), jnp.float32, -bound, bound)
        params.append((w, b))
    return params


def prepare_fcn_params(params, input_dim, *, compute_dtype=jnp.bfloat16):
    """Pad ONCE to lane-dense shapes and cast weights to the MXU compute dtype.

    Hoisting this out of the forward path removes the per-call pad/cast passes
    (which for a memory-bound FCN can cost as much as the kernel itself).
    Zero padding is exact: padded weight rows/cols are 0, padded bias lanes are
    0, ReLU(0) = 0, padded batch rows are sliced off.
    """
    dims = [input_dim] + [w.shape[1] for (w, _) in params]
    pdims = [_round_up(d, 128) for d in dims]
    padded = []
    for li, (w, b) in enumerate(params):
        din, dout = w.shape
        wp = (jnp.zeros((pdims[li], pdims[li + 1]), compute_dtype)
              .at[:din, :dout].set(w.astype(compute_dtype)))
        # Bias replicated across 8 sublanes -> full (8,128) vreg tiles; kept in
        # f32 so bias-add / ReLU stay on the f32 VPU path (v5e has no bf16 VPU).
        bp = (jnp.zeros((8, pdims[li + 1]), jnp.float32)
              .at[:, :dout].set(jnp.broadcast_to(b.astype(jnp.float32), (8, dout))))
        padded.append((wp, bp))
    return {"params": padded, "dims": dims, "pdims": pdims,
            "compute_dtype": compute_dtype}


# ----------------------------------------------------------------------------
# Forward pass (mirrors fashionFCNbatch.forward).
# ----------------------------------------------------------------------------
def fashion_fcn_batch_forward(prepared, x, *, batch_tile=512,
                              fused_vmem_budget_bytes=48 * 1024 * 1024):
    params = prepared["params"]
    dims = prepared["dims"]
    pdims = prepared["pdims"]
    cdt = prepared["compute_dtype"]
    num_layers = len(params)
    assert num_layers >= 1, "num_layers == 0 is undefined in the original module"

    B, D0 = x.shape
    assert D0 == dims[0]

    # ---- batch tiling: multiple of 8 sublanes; ensure >=2 grid blocks when the
    # batch is big enough so v7x's 2 TensorCores both get work. ----
    Bp8 = _round_up(B, 8)
    TB = min(batch_tile, Bp8)
    if Bp8 // TB < 2 and Bp8 >= 16:
        TB = _round_up((Bp8 + 1) // 2, 8)
    Bp = _round_up(Bp8, TB)

    # ---- input pad/cast, skipped entirely when already conforming ----
    if Bp == B and pdims[0] == D0 and x.dtype == cdt:
        xp = x
    else:
        xp = jnp.zeros((Bp, pdims[0]), cdt).at[:B, :D0].set(x.astype(cdt))

    # ---- VMEM budget for the fused, weights-resident scheme ----
    cbytes = jnp.dtype(cdt).itemsize
    w_bytes = sum(pdims[li] * pdims[li + 1] for li in range(num_layers)) * cbytes
    b_bytes = sum(8 * pdims[li + 1] for li in range(num_layers)) * 4
    io_bytes = 2 * TB * pdims[0] * cbytes + 2 * TB * pdims[-1] * 4   # dbl-buffered
    act_bytes = sum(TB * pd * 4 for pd in pdims)                     # in-kernel temps
    fused_vmem_bytes = w_bytes + b_bytes + io_bytes + act_bytes + (2 << 20)

    if fused_vmem_bytes <= fused_vmem_budget_bytes:
        # ---- fused path: weights/biases resident (single-buffered), activations
        # tiled over a "parallel" batch grid axis. ----
        in_specs = [pl.BlockSpec((TB, pdims[0]), lambda i: (i, 0))]
        flat = [xp]
        for li, (wp, bp) in enumerate(params):
            in_specs.append(pl.BlockSpec((pdims[li], pdims[li + 1]),
                                         lambda i: (0, 0),
                                         pipeline_mode=pl.Buffered(1)))
            in_specs.append(pl.BlockSpec((8, pdims[li + 1]),
                                         lambda i: (0, 0),
                                         pipeline_mode=pl.Buffered(1)))
            flat += [wp, bp]

        flops = 2 * Bp * sum(pdims[li] * pdims[li + 1] for li in range(num_layers))
        bytes_accessed = (Bp * pdims[0] * cbytes + w_bytes + b_bytes
                          + Bp * pdims[-1] * 4)

        out_padded = pl.pallas_call(
            functools.partial(_fcn_fused_kernel, num_layers=num_layers,
                              compute_dtype=cdt),
            out_shape=jax.ShapeDtypeStruct((Bp, pdims[-1]), jnp.float32),
            grid=(Bp // TB,),
            in_specs=in_specs,
            out_specs=pl.BlockSpec((TB, pdims[-1]), lambda i: (i, 0)),
            compiler_params=pltpu.CompilerParams(
                dimension_semantics=("parallel",),
                vmem_limit_bytes=int(min(max(fused_vmem_bytes, 32 << 20),
                                         100 << 20))),
            cost_estimate=pl.CostEstimate(flops=flops, transcendentals=0,
                                          bytes_accessed=bytes_accessed),
        )(*flat)
    else:
        # ---- fallback: per-layer K/N-tiled Linear(+ReLU); intermediate
        # activations stored in bf16 (same rounding as the fused path). ----
        y = xp
        for li, (wp, bp) in enumerate(params):
            last = li == num_layers - 1
            y = _tiled_linear(y, wp, bp, apply_relu=not last,
                              out_dtype=jnp.float32 if last else cdt)
        out_padded = y

    # TODO(synk): let downstream consumers take the padded (Bp, pdims[-1])
    # output directly to skip this extra HBM read+write of the result.
    return out_padded[:B, :dims[-1]]


if __name__ == "__main__":
    key = jax.random.PRNGKey(0)

    # Small FCN: num_layers = 3, dims 32 -> 64 -> 48 -> 16, batch = 8.
    layer_dim = [32, 64, 48, 16]
    batch = 8

    k_x, k_p = jax.random.split(key)
    x = jax.random.normal(k_x, (batch, layer_dim[0]), jnp.float32)
    params = init_fashion_fcn_params(k_p, layer_dim)

    # Pad / cast parameters ONCE (outside the steady-state forward path).
    prepared = prepare_fcn_params(params, layer_dim[0])

    # Fused path.
    out = jax.block_until_ready(fashion_fcn_batch_forward(prepared, x))
    assert out.shape == (batch, layer_dim[-1])

    # Force the K/N-tiled fallback path and make sure it agrees.
    out_tiled = jax.block_until_ready(
        fashion_fcn_batch_forward(prepared, x, fused_vmem_budget_bytes=0))

    # References:
    #  (a) same-precision reference (bf16 matmul operands, f32 accumulate/bias/ReLU)
    #  (b) pure-f32 reference (exact math of the PyTorch module), loose tolerance
    cdt = prepared["compute_dtype"]
    ref_bf16 = x
    ref_f32 = x
    for i, (w, b) in enumerate(params):
        ref_bf16 = jnp.dot(ref_bf16.astype(cdt), w.astype(cdt),
                           preferred_element_type=jnp.float32) + b
        ref_f32 = ref_f32 @ w + b
        if i < len(params) - 1:
            ref_bf16 = jnp.maximum(ref_bf16, 0.0)
            ref_f32 = jnp.maximum(ref_f32, 0.0)

    assert jnp.allclose(out, ref_bf16, atol=1e-2, rtol=1e-2)
    assert jnp.allclose(out, ref_f32, atol=1e-1, rtol=5e-2)
    assert jnp.allclose(out_tiled, out, atol=1e-2, rtol=1e-2)

    print("KERNEL_OK")
</pallas_src>

<mosaic_0001>
module attributes {stable_mosaic.version = 11 : i64} {
  func.func @_fcn_fused_kernel(%arg0: i32, %arg1: memref<8x128xbf16, #tpu.memory_space<vmem>>, %arg2: memref<128x128xbf16, #tpu.memory_space<vmem>>, %arg3: memref<8x128xf32, #tpu.memory_space<vmem>>, %arg4: memref<128x128xbf16, #tpu.memory_space<vmem>>, %arg5: memref<8x128xf32, #tpu.memory_space<vmem>>, %arg6: memref<128x128xbf16, #tpu.memory_space<vmem>>, %arg7: memref<8x128xf32, #tpu.memory_space<vmem>>, %arg8: memref<8x128xf32, #tpu.memory_space<vmem>>) attributes {dimension_semantics = [#tpu.dimension_semantics<parallel>], iteration_bounds = array<i64: 1>, scalar_prefetch = 0 : i64, scratch_operands = 0 : i64, tpu.core_type = #tpu.core_type<tc>, window_params = [{transform_indices = @transform_0, window_bounds = array<i64: 8, 128>}, {pipeline_mode = #tpu.pipeline_mode<synchronous>, transform_indices = @transform_1, window_bounds = array<i64: 128, 128>}, {pipeline_mode = #tpu.pipeline_mode<synchronous>, transform_indices = @transform_2, window_bounds = array<i64: 8, 128>}, {pipeline_mode = #tpu.pipeline_mode<synchronous>, transform_indices = @transform_3, window_bounds = array<i64: 128, 128>}, {pipeline_mode = #tpu.pipeline_mode<synchronous>, transform_indices = @transform_4, window_bounds = array<i64: 8, 128>}, {pipeline_mode = #tpu.pipeline_mode<synchronous>, transform_indices = @transform_5, window_bounds = array<i64: 128, 128>}, {pipeline_mode = #tpu.pipeline_mode<synchronous>, transform_indices = @transform_6, window_bounds = array<i64: 8, 128>}, {transform_indices = @transform_7, window_bounds = array<i64: 8, 128>}]} {
    %c0 = arith.constant 0 : index
    %c0_0 = arith.constant 0 : index
    %0 = vector.load %arg1[%c0, %c0_0] : memref<8x128xbf16, #tpu.memory_space<vmem>>, vector<8x128xbf16>
    %c0_1 = arith.constant 0 : index
    %c0_2 = arith.constant 0 : index
    %1 = vector.load %arg2[%c0_1, %c0_2] : memref<128x128xbf16, #tpu.memory_space<vmem>>, vector<128x128xbf16>
    %cst = arith.constant dense<0.000000e+00> : vector<8x128xf32>
    %2 = tpu.matmul %0, %1, %cst {dimension_numbers = #tpu.dot_dimension_numbers<[1], [0], [0], [1], [0, 0, 1, 1], [], []>} : vector<8x128xbf16>, vector<128x128xbf16>, vector<8x128xf32> -> vector<8x128xf32>
    %c0_3 = arith.constant 0 : index
    %c0_4 = arith.constant 0 : index
    %3 = vector.load %arg3[%c0_3, %c0_4] : memref<8x128xf32, #tpu.memory_space<vmem>>, vector<1x128xf32>
    %4 = vector.broadcast %3 : vector<1x128xf32> to vector<8x128xf32>
    %5 = arith.addf %2, %4 : vector<8x128xf32>
    %cst_5 = arith.constant 0.000000e+00 : f32
    %6 = vector.broadcast %cst_5 : f32 to vector<8x128xf32>
    %7 = arith.maximumf %5, %6 : vector<8x128xf32>
    %8 = arith.truncf %7 : vector<8x128xf32> to vector<8x128xbf16>
    %c0_6 = arith.constant 0 : index
    %c0_7 = arith.constant 0 : index
    %9 = vector.load %arg4[%c0_6, %c0_7] : memref<128x128xbf16, #tpu.memory_space<vmem>>, vector<128x128xbf16>
    %cst_8 = arith.constant dense<0.000000e+00> : vector<8x128xf32>
    %10 = tpu.matmul %8, %9, %cst_8 {dimension_numbers = #tpu.dot_dimension_numbers<[1], [0], [0], [1], [0, 0, 1, 1], [], []>} : vector<8x128xbf16>, vector<128x128xbf16>, vector<8x128xf32> -> vector<8x128xf32>
    %c0_9 = arith.constant 0 : index
    %c0_10 = arith.constant 0 : index
    %11 = vector.load %arg5[%c0_9, %c0_10] : memref<8x128xf32, #tpu.memory_space<vmem>>, vector<1x128xf32>
    %12 = vector.broadcast %11 : vector<1x128xf32> to vector<8x128xf32>
    %13 = arith.addf %10, %12 : vector<8x128xf32>
    %cst_11 = arith.constant 0.000000e+00 : f32
    %14 = vector.broadcast %cst_11 : f32 to vector<8x128xf32>
    %15 = arith.maximumf %13, %14 : vector<8x128xf32>
    %16 = arith.truncf %15 : vector<8x128xf32> to vector<8x128xbf16>
    %c0_12 = arith.constant 0 : index
    %c0_13 = arith.constant 0 : index
    %17 = vector.load %arg6[%c0_12, %c0_13] : memref<128x128xbf16, #tpu.memory_space<vmem>>, vector<128x128xbf16>
    %cst_14 = arith.constant dense<0.000000e+00> : vector<8x128xf32>
    %18 = tpu.matmul %16, %17, %cst_14 {dimension_numbers = #tpu.dot_dimension_numbers<[1], [0], [0], [1], [0, 0, 1, 1], [], []>} : vector<8x128xbf16>, vector<128x128xbf16>, vector<8x128xf32> -> vector<8x128xf32>
    %c0_15 = arith.constant 0 : index
    %c0_16 = arith.constant 0 : index
    %19 = vector.load %arg7[%c0_15, %c0_16] : memref<8x128xf32, #tpu.memory_space<vmem>>, vector<1x128xf32>
    %20 = vector.broadcast %19 : vector<1x128xf32> to vector<8x128xf32>
    %21 = arith.addf %18, %20 : vector<8x128xf32>
    %c0_17 = arith.constant 0 : index
    %c0_18 = arith.constant 0 : index
    %22 = vector.load %arg8[%c0_17, %c0_18] : memref<8x128xf32, #tpu.memory_space<vmem>>, vector<8x128xf32>
    tpu.vector_store %arg8[%c0_17, %c0_18], %21 {strides = array<i32>} : memref<8x128xf32, #tpu.memory_space<vmem>>, vector<8x128xf32>,
    return
  }
  func.func @transform_0(%arg0: i32) -> (i32, i32) {
    %c0_i32 = arith.constant 0 : i32
    %c0_i32_0 = arith.constant 0 : i32
    return %arg0, %c0_i32 : i32, i32
  }
  func.func @transform_1(%arg0: i32) -> (i32, i32) {
    %c0_i32 = arith.constant 0 : i32
    %c0_i32_0 = arith.constant 0 : i32
    %c0_i32_1 = arith.constant 0 : i32
    return %c0_i32, %c0_i32_0 : i32, i32
  }
  func.func @transform_2(%arg0: i32) -> (i32, i32) {
    %c0_i32 = arith.constant 0 : i32
    %c0_i32_0 = arith.constant 0 : i32
    %c0_i32_1 = arith.constant 0 : i32
    return %c0_i32, %c0_i32_0 : i32, i32
  }
  func.func @transform_3(%arg0: i32) -> (i32, i32) {
    %c0_i32 = arith.constant 0 : i32
    %c0_i32_0 = arith.constant 0 : i32
    %c0_i32_1 = arith.constant 0 : i32
    return %c0_i32, %c0_i32_0 : i32, i32
  }
  func.func @transform_4(%arg0: i32) -> (i32, i32) {
    %c0_i32 = arith.constant 0 : i32
    %c0_i32_0 = arith.constant 0 : i32
    %c0_i32_1 = arith.constant 0 : i32
    return %c0_i32, %c0_i32_0 : i32, i32
  }
  func.func @transform_5(%arg0: i32) -> (i32, i32) {
    %c0_i32 = arith.constant 0 : i32
    %c0_i32_0 = arith.constant 0 : i32
    %c0_i32_1 = arith.constant 0 : i32
    return %c0_i32, %c0_i32_0 : i32, i32
  }
  func.func @transform_6(%arg0: i32) -> (i32, i32) {
    %c0_i32 = arith.constant 0 : i32
    %c0_i32_0 = arith.constant 0 : i32
    %c0_i32_1 = arith.constant 0 : i32
    return %c0_i32, %c0_i32_0 : i32, i32
  }
  func.func @transform_7(%arg0: i32) -> (i32, i32) {
    %c0_i32 = arith.constant 0 : i32
    %c0_i32_0 = arith.constant 0 : i32
    return %arg0, %c0_i32 : i32, i32
  }
}

</mosaic_0001>

<bundles_post_ra>
// kernel: tpu_custom_call.1
= control target key start
LH: loop header
LB: loop body
LE: loop exit
PB: predicated region body
PF: predicated region fallthrough
CT: control target
= control target key end

     0   :  { %12 = vsyncpa [#allocation3], 0  ;;  %s897_s0 = inlined_call_operand.hbm [shape: bf16[8,128], index: 0, kind: input, shape index: {}]   ;;  %s898_s1 = inlined_call_operand.hbm [shape: bf16[128,128], index: 1, kind: input, shape index: {}]   ;;  %s899_s2 = inlined_call_operand.hbm [shape: f32[8,128], index: 2, kind: input, shape index: {}]   ;;  %s900_s3 = inlined_call_operand.hbm [shape: bf16[128,128], index: 3, kind: input, shape index: {}]   ;;  %s901_s4 = inlined_call_operand.vmem [shape: f32[8,128], index: 4, kind: input, shape index: {}]   ;;  %s902_s5 = inlined_call_operand.hbm [shape: bf16[128,128], index: 5, kind: input, shape index: {}]   ;;  %s903_s6 = inlined_call_operand.vmem [shape: f32[8,128], index: 6, kind: input, shape index: {}]   ;;  %s904_s7 = inlined_call_operand.hbm [shape: f32[8,128], index: 7, kind: output, shape index: {}]  }
   0x1   :  { %13 = vsyncpa [#allocation6], 0 }
   0x2   :  { %14 = vsyncpa [#allocation9], 0 }
   0x3   :  { %15 = vsyncpa [#allocation4], 0  ;;  %s730_s24 = smov [#allocation5]   ;;  %s590_s28 = scalar_lea.hbm %s898_s1, 1024 }
   0x4   :  { %s31_s25 = sshll.u32 %s730_s24, 4  ;;  %p591_p0 = scmp.ne.s32.totalorder %s898_s1, %s590_s28  ;;  %s32_s25 = int_to_ptr.vmem [resolvable:$true] %s31_s25 }
   0x5   :  { %p594_p1 = scmp.lt.u32.totalorder %s590_s28, %s898_s1 }
   0x7   :  { %p596_p2 = pnand %p594_p1, %p591_p0 }
   0x9   :  { %599 = shalt.err (!%p596_p2)
}
   0xa   :  { %s600_s10 = scalar_lea.vmem %s32_s25, 1024  ;;  %p605_p4 = scmp.lt.s32.totalorder %s32_s25, %s32_s25 }
   0xb   :  { %p601_p3 = scmp.ne.s32.totalorder %s32_s25, %s600_s10  ;;  %p606_p5 = scmp.lt.s32.totalorder %s600_s10, %s600_s10 }
   0xd   :  { %p607_p6 = por %p606_p5, %p605_p4 }
   0xf   :  { %p608_p7 = pnand %p607_p6, %p601_p3 }
  0x11   :  { %611 = shalt.err (!%p608_p7)
}
  0x12   :  { %s731_s11 = smov 64   ;;  %s732_s12 = smov 4  }
  0x13   :  { %37 = dma.hbm_to_vmem [thread:$0]  %s898_s1, 1024, %s32_s25, [#allocation6], %s731_s11, %s731_s11, %s732_s12  }
  0x14   :  { %s733_s15 = smov [#allocation8]   ;;  %s734_s17 = smov [#allocation2]  }
  0x15   :  { %s53_s16 = sshll.u32 %s733_s15, 4  ;;  %s22_s18 = sshll.u32 %s734_s17, 4  ;;  %s54_s16 = int_to_ptr.vmem [resolvable:$true] %s53_s16  ;;  %s23_s18 = int_to_ptr.vmem [resolvable:$true] %s22_s18 }
  0x16   :  { %s612_s21 = scalar_lea.hbm %s900_s3, 1024 }
  0x17   :  { %p613_p8 = scmp.ne.s32.totalorder %s900_s3, %s612_s21  ;;  %p616_p9 = scmp.lt.u32.totalorder %s612_s21, %s900_s3 }
  0x19   :  { %p618_p10 = pnand %p616_p9, %p613_p8 }
  0x1b   :  { %621 = shalt.err (!%p618_p10)
}
  0x1c   :  { %s622_s1 = scalar_lea.vmem %s54_s16, 1024  ;;  %p627_p12 = scmp.lt.s32.totalorder %s54_s16, %s54_s16 }
  0x1d   :  { %p623_p11 = scmp.ne.s32.totalorder %s54_s16, %s622_s1  ;;  %p628_p13 = scmp.lt.s32.totalorder %s622_s1, %s622_s1 }
  0x1f   :  { %p629_p0 = por %p628_p13, %p627_p12 }
  0x21   :  { %p630_p1 = pnand %p629_p0, %p623_p11 }
  0x23   :  { %633 = shalt.err (!%p630_p1)
}
  0x24   :  { %59 = dma.hbm_to_vmem [thread:$0]  %s900_s3, 1024, %s54_s16, [#allocation9], %s731_s11, %s731_s11, %s732_s12  }
  0x25   :  { %s634_s30 = scalar_lea.hbm %s897_s0, 64 }
  0x26   :  { %p635_p2 = scmp.ne.s32.totalorder %s897_s0, %s634_s30  ;;  %p638_p3 = scmp.lt.u32.totalorder %s634_s30, %s897_s0 }
  0x28   :  { %p640_p4 = pnand %p638_p3, %p635_p2 }
  0x2a   :  { %643 = shalt.err (!%p640_p4)
}
  0x2b   :  { %s644_s14 = scalar_lea.vmem %s23_s18, 64  ;;  %p649_p6 = scmp.lt.s32.totalorder %s23_s18, %s23_s18 }
  0x2c   :  { %p645_p5 = scmp.ne.s32.totalorder %s23_s18, %s644_s14  ;;  %p650_p7 = scmp.lt.s32.totalorder %s644_s14, %s644_s14 }
  0x2e   :  { %p651_p8 = por %p650_p7, %p649_p6 }
  0x30   :  { %p652_p9 = pnand %p651_p8, %p645_p5 }
  0x32   :  { %655 = shalt.err (!%p652_p9)
}
  0x33   :  { %25 = dma.hbm_to_vmem [thread:$0]  %s897_s0, 64, %s23_s18, [#allocation3]  }
  0x34   :  { %s735_s16 = smov [#allocation7]   ;;  %s736_s19 = smov [#allocation10]  }
  0x35   :  { %s44_s17 = sshll.u32 %s735_s16, 4  ;;  %s67_s20 = sshll.u32 %s736_s19, 4  ;;  %s45_s17 = int_to_ptr.vmem [resolvable:$true] %s44_s17  ;;  %s68_s20 = int_to_ptr.vmem [resolvable:$true] %s67_s20 }
  0x36   :  { %s656_s23 = scalar_lea.hbm %s899_s2, 128 }
  0x37   :  { %p657_p10 = scmp.ne.s32.totalorder %s899_s2, %s656_s23  ;;  %p660_p11 = scmp.lt.u32.totalorder %s656_s23, %s899_s2 }
  0x39   :  { %p662_p12 = pnand %p660_p11, %p657_p10 }
  0x3b   :  { %665 = shalt.err (!%p662_p12)
}
  0x3c   :  { %s666_s0 = scalar_lea.vmem %s45_s17, 128  ;;  %p671_p0 = scmp.lt.s32.totalorder %s45_s17, %s45_s17 }
  0x3d   :  { %p667_p13 = scmp.ne.s32.totalorder %s45_s17, %s666_s0  ;;  %p672_p1 = scmp.lt.s32.totalorder %s666_s0, %s666_s0 }
  0x3f   :  { %p673_p2 = por %p672_p1, %p671_p0 }
  0x41   :  { %p674_p3 = pnand %p673_p2, %p667_p13 }
  0x43   :  { %677 = shalt.err (!%p674_p3)
}
  0x44   :  { %47 = dma.hbm_to_vmem [thread:$0]  %s899_s2, 128, %s45_s17, [#allocation6]  }
  0x45   :  { %s678_s30 = scalar_lea.hbm %s902_s5, 1024 }
  0x46   :  { %p679_p4 = scmp.ne.s32.totalorder %s902_s5, %s678_s30  ;;  %p682_p5 = scmp.lt.u32.totalorder %s678_s30, %s902_s5 }
  0x48   :  { %p684_p6 = pnand %p682_p5, %p679_p4 }
  0x4a   :  { %687 = shalt.err (!%p684_p6)
}
  0x4b   :  { %s688_s14 = scalar_lea.vmem %s68_s20, 1024  ;;  %p693_p8 = scmp.lt.s32.totalorder %s68_s20, %s68_s20 }
  0x4c   :  { %p689_p7 = scmp.ne.s32.totalorder %s68_s20, %s688_s14  ;;  %p694_p9 = scmp.lt.s32.totalorder %s688_s14, %s688_s14 }
  0x4e   :  { %p695_p10 = por %p694_p9, %p693_p8 }
  0x50   :  { %p696_p11 = pnand %p695_p10, %p689_p7 }
  0x52   :  { %699 = shalt.err (!%p696_p11)
}
  0x53   :  { %73 = dma.hbm_to_vmem [thread:$0]  %s902_s5, 1024, %s68_s20, [#allocation9], %s731_s11, %s731_s11, %s732_s12  }
  0x54   :  { %722 = dma.done.wait [#allocation3], 64  }
  0x55   :  { %723 = vsyncadd [#allocation3], 4294967232 }
  0x56   :  { %724 = dma.done.wait [#allocation6], 1152  }
  0x57   :  { %725 = vsyncadd [#allocation6], 4294966144 }
  0x58   :  { %726 = dma.done.wait [#allocation9], 2048  }
  0x59   :  { %727 = vsyncadd [#allocation9], 4294965248  ;;  %v737_v0 = vmov 0.0   ;;  %vm738_vm0 = vmmov 0   ;;  %v566_v1 = vld [vmem:[#allocation5] sm:$0xff]   ;;  %v567_v2 = vld [vmem:[#allocation5 + $0x8] sm:$0xff]  }
  0x5a   :  { %496 = vmatprep.subr.bf16.mxu0 %v737_v0  ;;  %512 = vmatprep.mubr.msk.bf16.mxu0 %vm738_vm0, %v737_v0  ;;  %v568_v3 = vld [vmem:[#allocation5 + $0x10] sm:$0xff]   ;;  %v574_v4 = vld [vmem:[#allocation8] sm:$0xff]   ;;  %v569_v5 = vld [vmem:[#allocation5 + $0x18] sm:$0xff]   ;;  %s739_s16 = smov [#allocation11]  }
  0x5b   :  { %516 = vmatprep.subr.bf16.mxu1 %v737_v0  ;;  %532 = vmatprep.mubr.msk.bf16.mxu1 %vm738_vm0, %v737_v0  ;;  %v575_v6 = vld [vmem:[#allocation8 + $0x8] sm:$0xff]   ;;  %v570_v7 = vld [vmem:[#allocation5 + $0x20] sm:$0xff]   ;;  %v576_v8 = vld [vmem:[#allocation8 + $0x10] sm:$0xff]   ;;  %s431_s17 = sshll.u32 %s739_s16, 4  ;;  %s432_s17 = int_to_ptr.vmem [resolvable:$true] %s431_s17 }
  0x5c   :  { %497 = vmatpush3.bf16.msra.mxu0 %v566_v1  ;;  %517 = vmatpush3.bf16.msra.mxu1 %v574_v4  ;;  %v571_v9 = vld [vmem:[#allocation5 + $0x28] sm:$0xff]   ;;  %v577_v10 = vld [vmem:[#allocation8 + $0x18] sm:$0xff]   ;;  %v572_v11 = vld [vmem:[#allocation5 + $0x30] sm:$0xff]   ;;  %p705_p13 = scmp.lt.s32.totalorder %s432_s17, %s432_s17 }
  0x5d   :  { %498 = vmatprep.subr.bf16.mxu0 %v737_v0  ;;  %518 = vmatprep.subr.bf16.mxu1 %v737_v0  ;;  %v578_v12 = vld [vmem:[#allocation8 + $0x20] sm:$0xff]   ;;  %v573_v13 = vld [vmem:[#allocation5 + $0x38] sm:$0xff]   ;;  %v579_v14 = vld [vmem:[#allocation8 + $0x28] sm:$0xff]  }
  0x5e   :  { %v92_v15 = vld [vmem:[#allocation2] sm:$0xf]  ;;  %v581_v17 = vld [vmem:[#allocation8 + $0x38] sm:$0xff]   ;;  %v582_v18 = vld [vmem:[#allocation10] sm:$0xff]  }
  0x5f   :  { %v580_v16 = vld [vmem:[#allocation8 + $0x30] sm:$0xff]   ;;  %v583_v19 = vld [vmem:[#allocation10 + $0x8] sm:$0xff]   ;;  %v585_v21 = vld [vmem:[#allocation10 + $0x18] sm:$0xff]  }
  0x60   :  { %499 = vmatpush3.bf16.msra.mxu0 %v567_v2  ;;  %519 = vmatpush3.bf16.msra.mxu1 %v575_v6  ;;  %v584_v20 = vld [vmem:[#allocation10 + $0x10] sm:$0xff]   ;;  %v586_v22 = vld [vmem:[#allocation10 + $0x20] sm:$0xff]   ;;  %v587_v23 = vld [vmem:[#allocation10 + $0x28] sm:$0xff]  }
  0x61   :  { %500 = vmatprep.subr.bf16.mxu0 %v737_v0  ;;  %520 = vmatprep.subr.bf16.mxu1 %v737_v0  ;;  %v442_v24 = vld [vmem:[#allocation7] ss:$0 sm:$0xff]  ;;  %v588_v32 = vld [vmem:[#allocation10 + $0x30] sm:$0xff]   ;;  %v451_v34 = vld [vmem:[%s901_s4] ss:$0 sm:$0xff]  ;;  %s700_s4 = scalar_lea.vmem %s432_s17, 128 }
  0x62   :  { %v589_v33 = vld [vmem:[#allocation10 + $0x38] sm:$0xff]   ;;  %v460_v42 = vld [vmem:[%s903_s6] ss:$0 sm:$0xff]  ;;  %p701_p12 = scmp.ne.s32.totalorder %s432_s17, %s700_s4  ;;  %p706_p0 = scmp.lt.s32.totalorder %s700_s4, %s700_s4 }
  0x64   :  { %501 = vmatpush3.bf16.msra.mxu0 %v568_v3  ;;  %521 = vmatpush3.bf16.msra.mxu1 %v576_v8  ;;  %p707_p1 = por %p706_p0, %p705_p13 }
  0x65   :  { %502 = vmatprep.subr.bf16.mxu0 %v737_v0  ;;  %522 = vmatprep.subr.bf16.mxu1 %v737_v0 }
  0x66   :  { %p708_p2 = pnand %p707_p1, %p701_p12 }
  0x68   :  { %503 = vmatpush3.bf16.msra.mxu0 %v569_v5  ;;  %523 = vmatpush3.bf16.msra.mxu1 %v577_v10 }
  0x69   :  { %504 = vmatprep.subr.bf16.mxu0 %v737_v0  ;;  %524 = vmatprep.subr.bf16.mxu1 %v737_v0 }
  0x6c   :  { %505 = vmatpush3.bf16.msra.mxu0 %v570_v7  ;;  %525 = vmatpush3.bf16.msra.mxu1 %v578_v12 }
  0x6d   :  { %506 = vmatprep.subr.bf16.mxu0 %v737_v0  ;;  %526 = vmatprep.subr.bf16.mxu1 %v737_v0 }
  0x70   :  { %507 = vmatpush3.bf16.msra.mxu0 %v571_v9  ;;  %527 = vmatpush3.bf16.msra.mxu1 %v579_v14 }
  0x71   :  { %508 = vmatprep.subr.bf16.mxu0 %v737_v0  ;;  %528 = vmatprep.subr.bf16.mxu1 %v737_v0 }
  0x74   :  { %509 = vmatpush3.bf16.msra.mxu0 %v572_v11  ;;  %529 = vmatpush3.bf16.msra.mxu1 %v580_v16 }
  0x75   :  { %510 = vmatprep.subr.bf16.mxu0 %v737_v0  ;;  %530 = vmatprep.subr.bf16.mxu1 %v737_v0 }
  0x78   :  { %511 = vmatpush3.bf16.msra.mxu0 %v573_v13  ;;  %531 = vmatpush3.bf16.msra.mxu1 %v581_v17 }
  0x79   :  { %536 = vmatprep.subr.bf16.mxu0 %v737_v0 }
  0x7b   :  { %513 = vmatmul.mubr.bf16.vlgmr.msra.gmra.mrb[0].mxu0 %v92_v15 }
  0x7c   :  { %552 = vmatprep.mubr.msk.bf16.mxu0 %vm738_vm0, %v737_v0  ;;  %537 = vmatpush3.bf16.msra.mxu0 %v582_v18 }
  0x7d   :  { %538 = vmatprep.subr.bf16.mxu0 %v737_v0 }
  0x80   :  { %539 = vmatpush3.bf16.msra.mxu0 %v583_v19 }
  0x81   :  { %540 = vmatprep.subr.bf16.mxu0 %v737_v0 }
  0x84   :  { %541 = vmatpush3.bf16.msra.mxu0 %v584_v20 }
  0x85   :  { %542 = vmatprep.subr.bf16.mxu0 %v737_v0 }
  0x88   :  { %543 = vmatpush3.bf16.msra.mxu0 %v585_v21 }
  0x89   :  { %544 = vmatprep.subr.bf16.mxu0 %v737_v0 }
  0x8c   :  { %545 = vmatpush3.bf16.msra.mxu0 %v586_v22 }
  0x8d   :  { %546 = vmatprep.subr.bf16.mxu0 %v737_v0 }
  0x90   :  { %547 = vmatpush3.bf16.msra.mxu0 %v587_v23 }
  0x91   :  { %548 = vmatprep.subr.bf16.mxu0 %v737_v0 }
  0x94   :  { %549 = vmatpush3.bf16.msra.mxu0 %v588_v32 }
  0x95   :  { %550 = vmatprep.subr.bf16.mxu0 %v737_v0 }
  0x98   :  { %551 = vmatpush3.bf16.msra.mxu0 %v589_v33 }
 0x14e   :  { %v196_v25 = vpop.f32.mrb[0].mxu0 }
 0x14f   :  { %v197_v26 = vadd.f32 %v442_v24, %v196_v25  ;;  %v514_v27 = vpop.f32.mrb[1].mxu0 }
 0x150   :  { %v199_v28 = vpop.f32.mrb[2].mxu0 }
 0x151   :  { %v202_v29 = vmax.f32 %v197_v26, 0.0  ;;  %v515_v30 = vpop.f32.mrb[3].mxu0 }
 0x153   :  { %v203_v31 = vpack.c.bf16 %v202_v29, %v202_v29 }
 0x155   :  { %533 = vmatmul.mubr.bf16.vlgmr.msra.gmra.mrb[0].mxu1 %v203_v31 }
 0x228   :  { %v307_v35 = vpop.f32.mrb[0].mxu1 }
 0x229   :  { %v308_v36 = vadd.f32 %v451_v34, %v307_v35  ;;  %v534_v37 = vpop.f32.mrb[1].mxu1 }
 0x22a   :  { %v310_v38 = vpop.f32.mrb[2].mxu1 }
 0x22b   :  { %v313_v39 = vmax.f32 %v308_v36, 0.0  ;;  %v535_v40 = vpop.f32.mrb[3].mxu1 }
 0x22d   :  { %v314_v41 = vpack.c.bf16 %v313_v39, %v313_v39 }
 0x22f   :  { %553 = vmatmul.mubr.bf16.vlgmr.msra.gmra.mrb[4].mxu0 %v314_v41 }
 0x302   :  { %v418_v43 = vpop.f32.mrb[4].mxu0 }
 0x303   :  { %v419_v44 = vadd.f32 %v460_v42, %v418_v43  ;;  %v554_v45 = vpop.f32.mrb[5].mxu0 }
 0x304   :  { %v421_v46 = vpop.f32.mrb[6].mxu0 }
 0x305   :  { %424 = vst [vmem:[#allocation11] sm:$0xff] %v419_v44  ;;  %v555_v47 = vpop.f32.mrb[7].mxu0 }
 0x306   :  { %711 = shalt.err (!%p708_p2)
}
 0x307   :  { %s712_s6 = scalar_lea.hbm %s904_s7, 128 }
 0x308   :  { %p713_p3 = scmp.ne.s32.totalorder %s904_s7, %s712_s6  ;;  %p716_p4 = scmp.lt.u32.totalorder %s712_s6, %s904_s7 }
 0x30a   :  { %p718_p5 = pnand %p716_p4, %p713_p3 }
 0x30c   :  { %721 = shalt.err (!%p718_p5)
}
 0x30d   :  { %434 = dma.vmem_to_hbm [thread:$0]  %s432_s17, 128, %s904_s7, [#allocation4]  }
 0x30e   :  { %728 = dma.done.wait [#allocation4], 128  }
 0x30f   :  { %729 = vsyncadd [#allocation4], 4294967168 }
 0x310   :  { %438 = vsyncpa [#allocation3], 1 }
 0x311   :  { %439 = vsyncpa [#allocation6], 1 }
 0x312   :  { %440 = vsyncpa [#allocation9], 1 }
 0x313   :  { %441 = vsyncpa [#allocation4], 1 }

</bundles_post_ra>
